<compile_context>
chip_gen: v7x
topology: tpu7x:2x2x1
jax: 0.10.0
libtpu: 0.0.40
codegen_flags: <defaults>
</compile_context>

<pallas_src>
import functools

import numpy as np
import jax
import jax.numpy as jnp
from jax.experimental import pallas as pl
from jax.experimental.pallas import tpu as pltpu


def _convgroup_kernel(w_ref, x_ref, o_ref, *, k, wp, th):
    # w_ref: (K*K, COUT, Cin)        fused per-tap weights (bf16)
    # x_ref: (1, 1, Cin, L_in)       flat padded row tile with halo (bf16)
    # o_ref: (1, 1, COUT, L_out)     L_out = TH * Wp, padded-width flat layout
    x = x_ref[0, 0]                  # (Cin, L_in)
    cout = o_ref.shape[2]
    l_out = th * wp
    acc = jnp.zeros((cout, l_out), jnp.float32)
    # K*K tap matmuls, accumulated in f32.  Each tap is a static lane-offset
    # slice of the flat block: padded-image position (h+ky, w+kx) lives at
    # lane (ky*Wp + kx) + (h*Wp + w).
    for ky in range(k):
        for kx in range(k):
            s = ky * wp + kx         # static Python int -> static slice
            acc = acc + jnp.dot(
                w_ref[ky * k + kx],              # (COUT, Cin)
                x[:, s:s + l_out],               # (Cin, L_out)
                preferred_element_type=jnp.float32)
    o_ref[0, 0] = acc.astype(o_ref.dtype)


def convgroup_forward(x_nchw, w_dense_oikk, w_1x1_oi11, kernel_size, *,
                      mxu_dtype=jnp.bfloat16, out_dtype=None):
    """x_nchw: (N, Cin, H, W); w_dense: (MID, Cin, K, K); w_1x1: (COUT, MID, 1, 1)."""
    N, Cin, H, W = x_nchw.shape
    MID, Cin_w, K, K2 = w_dense_oikk.shape
    COUT = w_1x1_oi11.shape[0]
    assert K == kernel_size and K2 == kernel_size and Cin_w == Cin
    if K % 2 != 1:
        # PyTorch pad=(K-1)//2 is symmetric only for odd K; even K diverges.
        raise ValueError("ConvGroup Pallas kernel supports odd kernel_size only.")
    pad = (K - 1) // 2
    Wp = W + 2 * pad
    KK = K * K
    out_dtype = x_nchw.dtype if out_dtype is None else out_dtype

    # ---- trace-time weight fusion in f32 (same math as module.merge_tensor) ----
    w_fused = jnp.einsum("om,mcyx->ocyx",
                         w_1x1_oi11[:, :, 0, 0].astype(jnp.float32),
                         w_dense_oikk.astype(jnp.float32))
    # (COUT, Cin, K, K) -> (K, K, COUT, Cin) -> (K*K, COUT, Cin): tap-major.
    w_taps = jnp.transpose(w_fused, (2, 3, 0, 1)).reshape(KK, COUT, Cin)
    w_taps = w_taps.astype(mxu_dtype)

    # ---- VMEM budget / compiler params (v7x: 64 MiB physical VMEM) ----
    try:
        phys_vmem = getattr(pltpu.get_tpu_info(), "vmem_capacity_bytes", 64 * 2**20)
    except Exception:
        phys_vmem = 64 * 2**20
    vmem_limit = int(min(phys_vmem * 3 // 4, 100 * 2**20))   # ~48 MiB v7x, ~96 MiB v5e/v6e

    in_item = np.dtype(mxu_dtype).itemsize
    out_item = np.dtype(out_dtype).itemsize

    def _blocks_bytes(th):
        l_in = (th + 2 * pad) * Wp + 2 * pad
        l_out = th * Wp
        # double-buffered input + output blocks, plus resident weights.
        return (2 * (Cin * l_in * in_item + COUT * l_out * out_item)
                + KK * COUT * Cin * in_item)

    # Row-tile TH: largest divisor of H whose double-buffered blocks fit the
    # budget, preferring >=4 total grid steps (pipeline overlap + both v7x
    # TensorCores), then >=2, then whatever fits.
    divisors = [d for d in range(H, 0, -1) if H % d == 0]
    budget = int(vmem_limit * 0.8)
    TH = None
    for min_steps in (4, 2, 1):
        for d in divisors:
            if _blocks_bytes(d) <= budget and N * (H // d) >= min_steps:
                TH = d
                break
        if TH is not None:
            break
    if TH is None:
        TH = 1
    R = H // TH
    L_in = (TH + 2 * pad) * Wp + 2 * pad       # 2p trailing zeros so the last
    L_out = TH * Wp                            # tap's slice stays in-bounds

    # ---- pad + bf16-cast + halo row tiles, flattened.  One fused XLA copy,
    #      ~(TH+K-1)/TH of the input in bf16 -- no K*K im2col in HBM. ----
    x_pad = jnp.pad(x_nchw.astype(mxu_dtype),
                    ((0, 0), (0, 0), (pad, pad), (pad, pad)))
    tiles = [x_pad[:, :, r * TH: r * TH + TH + 2 * pad, :] for r in range(R)]
    x_blk = jnp.stack(tiles, axis=1).reshape(N, R, Cin, (TH + 2 * pad) * Wp)
    x_blk = jnp.pad(x_blk, ((0, 0), (0, 0), (0, 0), (0, 2 * pad)))   # (N,R,Cin,L_in)

    kernel = functools.partial(_convgroup_kernel, k=K, wp=Wp, th=TH)

    out_blk = pl.pallas_call(
        kernel,
        out_shape=jax.ShapeDtypeStruct((N, R, COUT, L_out), out_dtype),
        grid_spec=pltpu.PrefetchScalarGridSpec(
            num_scalar_prefetch=0,
            grid=(N, R),
            in_specs=[
                pl.BlockSpec((KK, COUT, Cin), lambda n, r: (0, 0, 0)),
                pl.BlockSpec((1, 1, Cin, L_in), lambda n, r: (n, r, 0, 0)),
            ],
            out_specs=pl.BlockSpec((1, 1, COUT, L_out), lambda n, r: (n, r, 0, 0)),
        ),
        compiler_params=pltpu.CompilerParams(
            dimension_semantics=("parallel", "parallel"),
            vmem_limit_bytes=vmem_limit),
    )(w_taps, x_blk)

    # Crop the Wp-W garbage columns and reassemble the row tiles -> NCHW.
    out = out_blk.reshape(N, R, COUT, TH, Wp)[..., :W]
    out = jnp.transpose(out, (0, 2, 1, 3, 4)).reshape(N, COUT, H, W)
    return out


def _reference(x_nchw, w_dense_oikk, w_1x1_oi11, kernel_size):
    pad = (kernel_size - 1) // 2
    y = jax.lax.conv_general_dilated(
        x_nchw, w_dense_oikk, window_strides=(1, 1),
        padding=((pad, pad), (pad, pad)),
        dimension_numbers=("NCHW", "OIHW", "NCHW"))
    y = jax.lax.conv_general_dilated(
        y, w_1x1_oi11, window_strides=(1, 1), padding="VALID",
        dimension_numbers=("NCHW", "OIHW", "NCHW"))
    return y


if __name__ == "__main__":
    # Small shapes consistent with the module's forward.
    N, IN_FEAT, MID_FEAT, OUT_FEAT, H, W, K = 2, 4, 16, 8, 16, 16, 3

    key = jax.random.PRNGKey(0)
    kx_, kd, k1 = jax.random.split(key, 3)

    x = jax.random.normal(kx_, (N, IN_FEAT, H, W), dtype=jnp.float32)
    # Deterministic parameter init (PyTorch Conv2d weight shapes, bias=False).
    w_dense = jax.random.normal(kd, (MID_FEAT, IN_FEAT, K, K), dtype=jnp.float32) * 0.1
    w_1x1 = jax.random.normal(k1, (OUT_FEAT, MID_FEAT, 1, 1), dtype=jnp.float32) * 0.1

    out = convgroup_forward(x, w_dense, w_1x1, K)
    out = jax.block_until_ready(out)

    ref = _reference(x, w_dense, w_1x1, K)
    assert out.shape == (N, OUT_FEAT, H, W)
    # bf16 MXU operands + fusing through MID=16 reassociate the fp sums ->
    # relaxed tolerance (expected worst-case abs error ~6e-3 at these magnitudes).
    assert jnp.allclose(out, ref, atol=2e-2, rtol=2e-2), "mismatch vs reference conv"

    print("KERNEL_OK")
</pallas_src>

<mosaic_0001>
module attributes {stable_mosaic.version = 11 : i64} {
  func.func @_convgroup_kernel(%arg0: i32, %arg1: i32, %arg2: memref<9x8x4xbf16, #tpu.memory_space<vmem>>, %arg3: memref<1x1x4x182xbf16, #tpu.memory_space<vmem>>, %arg4: memref<1x1x8x144xf32, #tpu.memory_space<vmem>>) attributes {dimension_semantics = [#tpu.dimension_semantics<parallel>, #tpu.dimension_semantics<parallel>], iteration_bounds = array<i64: 2, 2>, scalar_prefetch = 0 : i64, scratch_operands = 0 : i64, tpu.core_type = #tpu.core_type<tc>, window_params = [{pipeline_mode = #tpu.pipeline_mode<synchronous>, transform_indices = @transform_0, window_bounds = array<i64: 9, 8, 4>}, {transform_indices = @transform_1, window_bounds = array<i64: 1, 1, 4, 182>}, {transform_indices = @transform_2, window_bounds = array<i64: 1, 1, 8, 144>}]} {
    %c0 = arith.constant 0 : index
    %c0_0 = arith.constant 0 : index
    %c0_1 = arith.constant 0 : index
    %c0_2 = arith.constant 0 : index
    %0 = vector.load %arg3[%c0, %c0_0, %c0_1, %c0_2] : memref<1x1x4x182xbf16, #tpu.memory_space<vmem>>, vector<1x1x4x182xbf16>
    %1 = vector.shape_cast %0 : vector<1x1x4x182xbf16> to vector<4x182xbf16>
    %cst = arith.constant 0.000000e+00 : f32
    %2 = vector.broadcast %cst : f32 to vector<8x144xf32>
    %c0_3 = arith.constant 0 : index
    %c0_4 = arith.constant 0 : index
    %c0_5 = arith.constant 0 : index
    %3 = vector.load %arg2[%c0_3, %c0_4, %c0_5] : memref<9x8x4xbf16, #tpu.memory_space<vmem>>, vector<1x8x4xbf16>
    %4 = vector.shape_cast %3 : vector<1x8x4xbf16> to vector<8x4xbf16>
    %5 = vector.extract_strided_slice %1 {offsets = [0, 0], sizes = [4, 144], strides = [1, 1]} : vector<4x182xbf16> to vector<4x144xbf16>
    %cst_6 = arith.constant dense<0.000000e+00> : vector<8x144xf32>
    %6 = tpu.matmul %4, %5, %cst_6 {dimension_numbers = #tpu.dot_dimension_numbers<[1], [0], [0], [1], [0, 0, 1, 1], [], []>} : vector<8x4xbf16>, vector<4x144xbf16>, vector<8x144xf32> -> vector<8x144xf32>
    %7 = arith.addf %2, %6 : vector<8x144xf32>
    %c1 = arith.constant 1 : index
    %c0_7 = arith.constant 0 : index
    %c0_8 = arith.constant 0 : index
    %8 = vector.load %arg2[%c1, %c0_7, %c0_8] : memref<9x8x4xbf16, #tpu.memory_space<vmem>>, vector<1x8x4xbf16>
    %9 = vector.shape_cast %8 : vector<1x8x4xbf16> to vector<8x4xbf16>
    %10 = vector.extract_strided_slice %1 {offsets = [0, 1], sizes = [4, 144], strides = [1, 1]} : vector<4x182xbf16> to vector<4x144xbf16>
    %cst_9 = arith.constant dense<0.000000e+00> : vector<8x144xf32>
    %11 = tpu.matmul %9, %10, %cst_9 {dimension_numbers = #tpu.dot_dimension_numbers<[1], [0], [0], [1], [0, 0, 1, 1], [], []>} : vector<8x4xbf16>, vector<4x144xbf16>, vector<8x144xf32> -> vector<8x144xf32>
    %12 = arith.addf %7, %11 : vector<8x144xf32>
    %c2 = arith.constant 2 : index
    %c0_10 = arith.constant 0 : index
    %c0_11 = arith.constant 0 : index
    %13 = vector.load %arg2[%c2, %c0_10, %c0_11] : memref<9x8x4xbf16, #tpu.memory_space<vmem>>, vector<1x8x4xbf16>
    %14 = vector.shape_cast %13 : vector<1x8x4xbf16> to vector<8x4xbf16>
    %15 = vector.extract_strided_slice %1 {offsets = [0, 2], sizes = [4, 144], strides = [1, 1]} : vector<4x182xbf16> to vector<4x144xbf16>
    %cst_12 = arith.constant dense<0.000000e+00> : vector<8x144xf32>
    %16 = tpu.matmul %14, %15, %cst_12 {dimension_numbers = #tpu.dot_dimension_numbers<[1], [0], [0], [1], [0, 0, 1, 1], [], []>} : vector<8x4xbf16>, vector<4x144xbf16>, vector<8x144xf32> -> vector<8x144xf32>
    %17 = arith.addf %12, %16 : vector<8x144xf32>
    %c3 = arith.constant 3 : index
    %c0_13 = arith.constant 0 : index
    %c0_14 = arith.constant 0 : index
    %18 = vector.load %arg2[%c3, %c0_13, %c0_14] : memref<9x8x4xbf16, #tpu.memory_space<vmem>>, vector<1x8x4xbf16>
    %19 = vector.shape_cast %18 : vector<1x8x4xbf16> to vector<8x4xbf16>
    %20 = vector.extract_strided_slice %1 {offsets = [0, 18], sizes = [4, 144], strides = [1, 1]} : vector<4x182xbf16> to vector<4x144xbf16>
    %cst_15 = arith.constant dense<0.000000e+00> : vector<8x144xf32>
    %21 = tpu.matmul %19, %20, %cst_15 {dimension_numbers = #tpu.dot_dimension_numbers<[1], [0], [0], [1], [0, 0, 1, 1], [], []>} : vector<8x4xbf16>, vector<4x144xbf16>, vector<8x144xf32> -> vector<8x144xf32>
    %22 = arith.addf %17, %21 : vector<8x144xf32>
    %c4 = arith.constant 4 : index
    %c0_16 = arith.constant 0 : index
    %c0_17 = arith.constant 0 : index
    %23 = vector.load %arg2[%c4, %c0_16, %c0_17] : memref<9x8x4xbf16, #tpu.memory_space<vmem>>, vector<1x8x4xbf16>
    %24 = vector.shape_cast %23 : vector<1x8x4xbf16> to vector<8x4xbf16>
    %25 = vector.extract_strided_slice %1 {offsets = [0, 19], sizes = [4, 144], strides = [1, 1]} : vector<4x182xbf16> to vector<4x144xbf16>
    %cst_18 = arith.constant dense<0.000000e+00> : vector<8x144xf32>
    %26 = tpu.matmul %24, %25, %cst_18 {dimension_numbers = #tpu.dot_dimension_numbers<[1], [0], [0], [1], [0, 0, 1, 1], [], []>} : vector<8x4xbf16>, vector<4x144xbf16>, vector<8x144xf32> -> vector<8x144xf32>
    %27 = arith.addf %22, %26 : vector<8x144xf32>
    %c5 = arith.constant 5 : index
    %c0_19 = arith.constant 0 : index
    %c0_20 = arith.constant 0 : index
    %28 = vector.load %arg2[%c5, %c0_19, %c0_20] : memref<9x8x4xbf16, #tpu.memory_space<vmem>>, vector<1x8x4xbf16>
    %29 = vector.shape_cast %28 : vector<1x8x4xbf16> to vector<8x4xbf16>
    %30 = vector.extract_strided_slice %1 {offsets = [0, 20], sizes = [4, 144], strides = [1, 1]} : vector<4x182xbf16> to vector<4x144xbf16>
    %cst_21 = arith.constant dense<0.000000e+00> : vector<8x144xf32>
    %31 = tpu.matmul %29, %30, %cst_21 {dimension_numbers = #tpu.dot_dimension_numbers<[1], [0], [0], [1], [0, 0, 1, 1], [], []>} : vector<8x4xbf16>, vector<4x144xbf16>, vector<8x144xf32> -> vector<8x144xf32>
    %32 = arith.addf %27, %31 : vector<8x144xf32>
    %c6 = arith.constant 6 : index
    %c0_22 = arith.constant 0 : index
    %c0_23 = arith.constant 0 : index
    %33 = vector.load %arg2[%c6, %c0_22, %c0_23] : memref<9x8x4xbf16, #tpu.memory_space<vmem>>, vector<1x8x4xbf16>
    %34 = vector.shape_cast %33 : vector<1x8x4xbf16> to vector<8x4xbf16>
    %35 = vector.extract_strided_slice %1 {offsets = [0, 36], sizes = [4, 144], strides = [1, 1]} : vector<4x182xbf16> to vector<4x144xbf16>
    %cst_24 = arith.constant dense<0.000000e+00> : vector<8x144xf32>
    %36 = tpu.matmul %34, %35, %cst_24 {dimension_numbers = #tpu.dot_dimension_numbers<[1], [0], [0], [1], [0, 0, 1, 1], [], []>} : vector<8x4xbf16>, vector<4x144xbf16>, vector<8x144xf32> -> vector<8x144xf32>
    %37 = arith.addf %32, %36 : vector<8x144xf32>
    %c7 = arith.constant 7 : index
    %c0_25 = arith.constant 0 : index
    %c0_26 = arith.constant 0 : index
    %38 = vector.load %arg2[%c7, %c0_25, %c0_26] : memref<9x8x4xbf16, #tpu.memory_space<vmem>>, vector<1x8x4xbf16>
    %39 = vector.shape_cast %38 : vector<1x8x4xbf16> to vector<8x4xbf16>
    %40 = vector.extract_strided_slice %1 {offsets = [0, 37], sizes = [4, 144], strides = [1, 1]} : vector<4x182xbf16> to vector<4x144xbf16>
    %cst_27 = arith.constant dense<0.000000e+00> : vector<8x144xf32>
    %41 = tpu.matmul %39, %40, %cst_27 {dimension_numbers = #tpu.dot_dimension_numbers<[1], [0], [0], [1], [0, 0, 1, 1], [], []>} : vector<8x4xbf16>, vector<4x144xbf16>, vector<8x144xf32> -> vector<8x144xf32>
    %42 = arith.addf %37, %41 : vector<8x144xf32>
    %c8 = arith.constant 8 : index
    %c0_28 = arith.constant 0 : index
    %c0_29 = arith.constant 0 : index
    %43 = vector.load %arg2[%c8, %c0_28, %c0_29] : memref<9x8x4xbf16, #tpu.memory_space<vmem>>, vector<1x8x4xbf16>
    %44 = vector.shape_cast %43 : vector<1x8x4xbf16> to vector<8x4xbf16>
    %45 = vector.extract_strided_slice %1 {offsets = [0, 38], sizes = [4, 144], strides = [1, 1]} : vector<4x182xbf16> to vector<4x144xbf16>
    %cst_30 = arith.constant dense<0.000000e+00> : vector<8x144xf32>
    %46 = tpu.matmul %44, %45, %cst_30 {dimension_numbers = #tpu.dot_dimension_numbers<[1], [0], [0], [1], [0, 0, 1, 1], [], []>} : vector<8x4xbf16>, vector<4x144xbf16>, vector<8x144xf32> -> vector<8x144xf32>
    %47 = arith.addf %42, %46 : vector<8x144xf32>
    %c0_31 = arith.constant 0 : index
    %c0_32 = arith.constant 0 : index
    %c0_33 = arith.constant 0 : index
    %c0_34 = arith.constant 0 : index
    %48 = vector.load %arg4[%c0_31, %c0_32, %c0_33, %c0_34] : memref<1x1x8x144xf32, #tpu.memory_space<vmem>>, vector<1x1x8x144xf32>
    %49 = vector.shape_cast %48 : vector<1x1x8x144xf32> to vector<8x144xf32>
    %50 = vector.shape_cast %47 : vector<8x144xf32> to vector<1x1x8x144xf32>
    tpu.vector_store %arg4[%c0_31, %c0_32, %c0_33, %c0_34], %50 {strides = array<i32>} : memref<1x1x8x144xf32, #tpu.memory_space<vmem>>, vector<1x1x8x144xf32>,
    return
  }
  func.func @transform_0(%arg0: i32, %arg1: i32) -> (i32, i32, i32) {
    %c0_i32 = arith.constant 0 : i32
    %c0_i32_0 = arith.constant 0 : i32
    %c0_i32_1 = arith.constant 0 : i32
    %c0_i32_2 = arith.constant 0 : i32
    return %c0_i32, %c0_i32_0, %c0_i32_1 : i32, i32, i32
  }
  func.func @transform_1(%arg0: i32, %arg1: i32) -> (i32, i32, i32, i32) {
    %c0_i32 = arith.constant 0 : i32
    %c0_i32_0 = arith.constant 0 : i32
    %c0_i32_1 = arith.constant 0 : i32
    return %arg0, %arg1, %c0_i32, %c0_i32_0 : i32, i32, i32, i32
  }
  func.func @transform_2(%arg0: i32, %arg1: i32) -> (i32, i32, i32, i32) {
    %c0_i32 = arith.constant 0 : i32
    %c0_i32_0 = arith.constant 0 : i32
    %c0_i32_1 = arith.constant 0 : i32
    return %arg0, %arg1, %c0_i32, %c0_i32_0 : i32, i32, i32, i32
  }
}

</mosaic_0001>

<bundles_post_ra>
// kernel: tpu_custom_call.1
= control target key start
LH: loop header
LB: loop body
LE: loop exit
PB: predicated region body
PF: predicated region fallthrough
CT: control target
= control target key end

     0   :  { %7 = vsyncpa [#allocation3], 0  ;;  %s1287_s0 = inlined_call_operand.vmem [shape: bf16[9,8,4], index: 0, kind: input, shape index: {}]   ;;  %s1288_s1 = inlined_call_operand.vmem [shape: bf16[2,2,4,182], index: 1, kind: input, shape index: {}]   ;;  %s1289_s2 = inlined_call_operand.hbm [shape: f32[2,2,8,144], index: 2, kind: output, shape index: {}]  }
   0x1   :  { %9 = vsyncpa [#allocation3 + $0x1], 0  ;;  %s1087_s9 = smov 0   ;;  %s1089_s10 = smov 0  }
   0x2   :  { %s1091_s11 = smov 0   ;;  %s1093_s12 = smov 0  }
   0x3   :  { %s1095_s13 = smov 0   ;;  %s1097_s14 = smov 0  }
   0x4   :  { %s1099_s15 = smov 0   ;;  %s1101_s16 = smov 0  }
   0x5 LB: > { %s814_s17 = sadd.s32 4294967295, %s1060_s16   ;;  %s815_s18 = sadd.s32 4294967294, %s1060_s16   ;;  %s1060_s16 = sphi %s1101_s16, %s15_s16   ;;  %s1056_s15 = sphi %s1099_s15, %s1298_s15   ;;  %s1052_s14 = sphi %s1097_s14, %s1297_s14   ;;  %s1048_s13 = sphi %s1095_s13, %s1296_s13   ;;  %s1044_s12 = sphi %s1093_s12, %s1295_s12   ;;  %s1040_s11 = sphi %s1091_s11, %s1294_s11   ;;  %s1036_s10 = sphi %s1089_s10, %s1293_s10   ;;  %s1032_s9 = sphi %s1087_s9, %s1292_s9  }
   0x6   : > { %s24_s19 = sadd.s32 1, %s1052_s14  ;;  %s27_s20 = sadd.s32 1, %s1056_s15 }
   0x7   : > { %p25_p0 = scmp.ge.s32.totalorder %s24_s19, 2  ;;  %p95_p1 = scmp.ne.s32.totalorder %s1040_s11, %s1036_s10 }
   0x8   : > { %p96_p2 = scmp.eq.s32.totalorder %s814_s17, 3  ;;  %p101_p5 = scmp.ne.s32.totalorder %s1036_s10, %s1032_s9 }
   0x9   : > { %s1300_s19 = smov (%p25_p0, %s24_s19), 0  ;;  %s1302_s20 = smov (!%p25_p0, %s27_s20), %s1056_s15 }
   0xa   : > { %s81_s21 = ssub.s32 %s1052_s14, %s1300_s19  ;;  %p1138_p3 = por %p96_p2, %p95_p1 }
   0xb   : > { %p29_p4 = scmp.ge.s32.totalorder %s1302_s20, 2  ;;  %p102_p6 = scmp.eq.s32.totalorder %s815_s18, 3 }
   0xc   : > { %p818_p7 = scmp.ge.s32.totalorder %s1060_s16, 1  ;;  %p135_p9 = scmp.lt.s32.totalorder %s1060_s16, 5 }
   0xd   : > { %s1304_s20 = smov (%p29_p4, %s1302_s20), 0  ;;  %p1147_p8 = por %p102_p6, %p101_p5 }
   0xe   : > { %s80_s24 = ssub.s32 %s1056_s15, %s1304_s20  ;;  %s85_s25 = sadd.s32 1, %s1040_s11 }
   0xf   : > { %s82_s26 = sor.u32 %s81_s21, %s80_s24  ;;  %p136_p10 = pnand %p818_p7, %p135_p9 }
  0x10   : > { %p83_p11 = scmp.eq.s32.totalorder %s82_s26, 0  ;;  %p161_p12 = scmp.lt.s32.totalorder (!%p136_p10), %s1048_s13, 1  ;;  %v1062_v0 = vmov (!%p136_p10), 0   ;;  %vm194_vm0 = vcmask (!%p136_p10), 1041408   ;;  %vm188_vm1 = vcmask (!%p136_p10), 1039360   ;;  %vm418_vm2 = vcmask (!%p136_p10), 891904  }
  0x11   : > { %139 = sbr.rel (%p136_p10) target bundleno = 433 (0x1b1), region = 28  ;;  %p163_p13 = scmp.lt.s32.totalorder (!%p136_p10), %s1044_s12, 1  ;;  %233 = vmatprep.mubr.bf16.mxu1 (!%p136_p10), %v1062_v0  ;;  %461 = vmatprep.mubr.bf16.mxu0 (!%p136_p10), %v1062_v0  ;;  %vm478_vm3 = vcmask (!%p136_p10), 883712   ;;  %v823_v11 = vld [vmem:[%s1287_s0 + $0x4] sm:$0xf] (!%p136_p10)  ;;  %vm190_vm4 = vcmask (!%p136_p10), 31744  }
  0x12   : > { %s1156_s27 = scalar_select %p83_p11, %s1040_s11, %s85_s25  }
  0x13   : > { %s1063_s17 = smov (!%p136_p10), 127   ;;  %s1064_s18 = smov (!%p136_p10), 109   ;;  %v835_v12 = vld [vmem:[%s1287_s0 + $0x10] sm:$0xf] (!%p136_p10)  ;;  %vm538_vm5 = vcmask (!%p136_p10), 752640   ;;  %vm298_vm6 = vcmask (!%p136_p10), 1031168  }
  0x14   : > { %s1065_s21 = smov (!%p136_p10), 108   ;;  %s1066_s24 = smov (!%p136_p10), 92   ;;  %v172_v24 = vld [vmem:[%s1287_s0] sm:$0xf] (!%p136_p10)  ;;  %v838_v25 = vld [vmem:[%s1287_s0 + $0x14] sm:$0xf] (!%p136_p10) }
  0x15   : > { %s1067_s25 = smov (!%p136_p10), 126   ;;  %s1068_s26 = smov (!%p136_p10), 91   ;;  %vm598_vm7 = vcmask (!%p136_p10), 744448   ;;  %vm358_vm8 = vcmask (!%p136_p10), 900096   ;;  %v829_v34 = vld [vmem:[%s1287_s0 + $0x8] sm:$0xf] (!%p136_p10) }
  0x16   : > { %v841_v35 = vld [vmem:[%s1287_s0 + $0x18] sm:$0xf] (!%p136_p10)  ;;  %vm658_vm9 = vcmask (!%p136_p10), 736256   ;;  %v832_v41 = vld [vmem:[%s1287_s0 + $0xc] sm:$0xf] (!%p136_p10)  ;;  %s851_s7 = sshll.u32 (!%p136_p10), %s1044_s12, 1 }
  0x17   : > { %v844_v42 = vld [vmem:[%s1287_s0 + $0x1c] sm:$0xf] (!%p136_p10)  ;;  %v847_v44 = vld [vmem:[%s1287_s0 + $0x20] sm:$0xf] (!%p136_p10)  ;;  %vm713_vm10 = vcmask (!%p136_p10), 130048  }
  0x18   : > { %s162_s28 = scalar_select %p161_p12, %s1048_s13, 1 }
  0x19   : > { %s164_s29 = scalar_select %p163_p13, %s1044_s12, 1 }
  0x1a   : > { %s821_s30 = sshll.u32 %s162_s28, 2  ;;  %s1069_s28 = smov 110  }
  0x1b   : > { %s820_s3 = sshll.u32 %s164_s29, 1  ;;  %s1070_s29 = smov 90  }
  0x1c   : > { %s167_s4 = sadd.s32 %s821_s30, %s820_s3 }
  0x1d   : > { %s822_s5 = sshll.u32 %s167_s4, 1 }
  0x1e   : > { %s169_s8 = scalar_lea.vmem %s1288_s1, %s822_s5  ;;  %s158_s5 = sand.u32 1, %s1036_s10  }
  0x1f   : > { %v824_v1 = vld.sshfl [vmem:[%s169_s8] sm:$0x33 pattern:$0x76325410]  ;;  %s819_s6 = sshll.u32 %s158_s5, 4  ;;  %s852_s8 = sshll.u32 %s1048_s13, 2 }
  0x20   : > { %184 = vrot.lane.b32.xlu1 %v824_v1, %s1063_s17  ;;  %414 = vrot.lane.b32.xlu0 %v824_v1, %s1064_s18  ;;  %v183_v2 = vcombine.high %v824_v1, %v824_v1  ;;  %v246_v15 = vsel %vm194_vm0, %v824_v1, 0  ;;  %s716_s12 = scalar_lea.sflag [#allocation3], %s158_s5 }
  0x24   : > { %186 = vrot.lane.b32.xlu1 %v183_v2, %s1063_s17  ;;  %416 = vrot.lane.b32.xlu0 %v183_v2, %s1064_s18  ;;  %s728_s17 = sadd.s32 %s852_s8, %s851_s7 }
  0x25   : > { %s853_s18 = sshll.u32 %s728_s17, 7 }
  0x28   : > { %476 = vrot.lane.b32.xlu1 %v183_v2, %s1065_s21  ;;  %474 = vrot.lane.b32.xlu0 %v824_v1, %s1065_s21  ;;  %s160_s21 = scalar_lea.vmem [#allocation2], %s819_s6 }
  0x2c   : > { %536 = vrot.lane.b32.xlu1 %v183_v2, %s1066_s24  ;;  %534 = vrot.lane.b32.xlu0 %v824_v1, %s1066_s24  ;;  %s732_s24 = sshll.u32 %s160_s21, 4  ;;  %s1236_s24 = int_to_ptr.vmem [resolvable:$true] %s732_s24 }
  0x2d   : > { %s966_s13 = scalar_lea.vmem %s1236_s24, 256 }
  0x2e   : > { %p967_p0 = scmp.ne.s32.totalorder %s1236_s24, %s966_s13 }
  0x30   : > { %296 = vrot.lane.b32.xlu1 %v183_v2, %s1067_s25  ;;  %294 = vrot.lane.b32.xlu0 %v824_v1, %s1067_s25  ;;  %p968_p1 = pnand %p967_p0, %p1138_p3 }
  0x32   : > { %p969_p2 = pneg %p968_p1 }
  0x34   : > { %596 = vrot.lane.b32.xlu1 %v183_v2, %s1068_s26  ;;  %594 = vrot.lane.b32.xlu0 %v824_v1, %s1068_s26 }
  0x38   : > { %356 = vrot.lane.b32.xlu1 %v183_v2, %s1069_s28  ;;  %354 = vrot.lane.b32.xlu0 %v824_v1, %s1069_s28  ;;  %s1234_s28 = scalar_lea.hbm %s1289_s2, %s853_s18 }
  0x3c   : > { %656 = vrot.lane.b32.xlu1 %v183_v2, %s1070_s29  ;;  %654 = vrot.lane.b32.xlu0 %v824_v1, %s1070_s29  ;;  %s1071_s29 = smov [#allocation2]  }
  0x3d   : > { %s970_s30 = sshll.u32 %s1071_s29, 4  ;;  %s971_s30 = int_to_ptr.vmem [resolvable:$false] %s970_s30 }
  0x3e   : > { %s972_s3 = scalar_lea.vmem %s971_s30, 512  ;;  %p973_p4 = scmp.lt.s32.totalorder %s1236_s24, %s971_s30 }
  0x3f   : > { %p974_p5 = scmp.lt.s32.totalorder %s972_s3, %s966_s13 }
  0x41   : > { %p975_p6 = por %p974_p5, %p973_p4 }
  0x43   : > { %p976_p7 = pnand %p975_p6, %p969_p2 }
  0x92   : > { %v185_v3 = vpop.permute.xlu1 %184  ;;  %v415_v4 = vpop.permute.xlu0 %414 }
  0x96   : > { %v187_v5 = vpop.permute.xlu1 %186  ;;  %v417_v6 = vpop.permute.xlu0 %416 }
  0x97   : > { %825 = vmatprep.subr.msk.bf16.mxu1 %vm194_vm0, %v187_v5  ;;  %836 = vmatprep.subr.msk.bf16.mxu0 %vm194_vm0, %v417_v6  ;;  %v189_v7 = vsel %vm188_vm1, %v185_v3, %v187_v5  ;;  %v419_v8 = vsel %vm418_vm2, %v415_v4, %v417_v6 }
  0x98   : > { %v196_v9 = vsel %vm194_vm0, %v189_v7, 0  ;;  %v424_v10 = vsel %vm194_vm0, %v419_v8, 0 }
  0x99   : > { %202 = vmatpush1.bf16.msra.mxu1 %v196_v9  ;;  %430 = vmatpush1.bf16.msra.mxu0 %v424_v10 }
  0x9a   : > { %v477_v13 = vpop.permute.xlu1 %476  ;;  %v475_v14 = vpop.permute.xlu0 %474  ;;  %827 = vmatprep.subr.msk.bf16.mxu1 %vm194_vm0, %v183_v2 }
  0x9b   : > { %v479_v16 = vsel %vm478_vm3, %v475_v14, %v477_v13  ;;  %839 = vmatprep.subr.msk.bf16.mxu0 %vm194_vm0, %v477_v13 }
  0x9c   : > { %v484_v17 = vsel %vm194_vm0, %v479_v16, 0  ;;  %826 = vmatmul.mubr.msk.bf16.vlgmr.msra.gmra.mrb[0].mxu1 %vm190_vm4, %v823_v11  ;;  %837 = vmatmul.mubr.msk.bf16.vlgmr.msra.gmra.mrb[0].mxu0 %vm190_vm4, %v835_v12 }
  0x9d   : > { %490 = vmatpush1.bf16.msra.mxu0 %v484_v17  ;;  %252 = vmatpush1.bf16.msra.mxu1 %v246_v15 }
  0x9e   : > { %v537_v18 = vpop.permute.xlu1 %536  ;;  %v535_v19 = vpop.permute.xlu0 %534  ;;  %283 = vmatprep.mubr.bf16.mxu1 %v1062_v0  ;;  %521 = vmatprep.mubr.bf16.mxu0 %v1062_v0 }
  0x9f   : > { %842 = vmatprep.subr.msk.bf16.mxu0 %vm194_vm0, %v537_v18  ;;  %v539_v22 = vsel %vm538_vm5, %v535_v19, %v537_v18 }
  0xa0   : > { %v544_v26 = vsel %vm194_vm0, %v539_v22, 0 }
  0xa2   : > { %v297_v20 = vpop.permute.xlu1 %296  ;;  %v295_v21 = vpop.permute.xlu0 %294 }
  0xa3   : > { %v299_v23 = vsel %vm298_vm6, %v295_v21, %v297_v20  ;;  %830 = vmatprep.subr.msk.bf16.mxu1 %vm194_vm0, %v297_v20 }
  0xa4   : > { %v304_v27 = vsel %vm194_vm0, %v299_v23, 0 }
  0xa6   : > { %v597_v28 = vpop.permute.xlu1 %596  ;;  %v595_v29 = vpop.permute.xlu0 %594 }
  0xa7   : > { %v599_v32 = vsel %vm598_vm7, %v595_v29, %v597_v28 }
  0xa8   : > { %828 = vmatmul.mubr.msk.bf16.vlgmr.msra.gmra.mrb[0].mxu1 %vm190_vm4, %v172_v24  ;;  %840 = vmatmul.mubr.msk.bf16.vlgmr.msra.gmra.mrb[0].mxu0 %vm190_vm4, %v838_v25  ;;  %v604_v36 = vsel %vm194_vm0, %v599_v32, 0 }
  0xa9   : > { %550 = vmatpush1.bf16.msra.mxu0 %v544_v26  ;;  %310 = vmatpush1.bf16.msra.mxu1 %v304_v27 }
  0xaa   : > { %341 = vmatprep.mubr.bf16.mxu1 %v1062_v0  ;;  %581 = vmatprep.mubr.bf16.mxu0 %v1062_v0  ;;  %v357_v30 = vpop.permute.xlu1 %356  ;;  %v355_v31 = vpop.permute.xlu0 %354 }
  0xab   : > { %845 = vmatprep.subr.msk.bf16.mxu0 %vm194_vm0, %v597_v28  ;;  %833 = vmatprep.subr.msk.bf16.mxu1 %vm194_vm0, %v357_v30  ;;  %v359_v33 = vsel %vm358_vm8, %v355_v31, %v357_v30 }
  0xac   : > { %v364_v37 = vsel %vm194_vm0, %v359_v33, 0 }
  0xae   : > { %v657_v38 = vpop.permute.xlu1 %656  ;;  %v655_v39 = vpop.permute.xlu0 %654 }
  0xaf   : > { %v659_v40 = vsel %vm658_vm9, %v655_v39, %v657_v38 }
  0xb0   : > { %v664_v43 = vsel %vm194_vm0, %v659_v40, 0 }
  0xb4   : > { %831 = vmatmul.mubr.msk.bf16.vlgmr.msra.gmra.mrb[0].mxu1 %vm190_vm4, %v829_v34  ;;  %843 = vmatmul.mubr.msk.bf16.vlgmr.msra.gmra.mrb[0].mxu0 %vm190_vm4, %v841_v35 }
  0xb5   : > { %610 = vmatpush1.bf16.msra.mxu0 %v604_v36  ;;  %370 = vmatpush1.bf16.msra.mxu1 %v364_v37 }
  0xb6   : > { %401 = vmatprep.mubr.bf16.mxu1 %v1062_v0  ;;  %641 = vmatprep.mubr.bf16.mxu0 %v1062_v0 }
  0xb7   : > { %848 = vmatprep.subr.msk.bf16.mxu0 %vm194_vm0, %v657_v38 }
  0xc0   : > { %834 = vmatmul.mubr.msk.bf16.vlgmr.msra.gmra.mrb[0].mxu1 %vm190_vm4, %v832_v41  ;;  %846 = vmatmul.mubr.msk.bf16.vlgmr.msra.gmra.mrb[0].mxu0 %vm190_vm4, %v844_v42 }
  0xc1   : > { %670 = vmatpush1.bf16.msra.mxu0 %v664_v43  ;;  %701 = vmatprep.mubr.bf16.mxu0 %v1062_v0 }
  0xcc   : > { %849 = vmatmul.mubr.msk.bf16.vlgmr.msra.gmra.mrb[0].mxu0 %vm190_vm4, %v847_v44 }
 0x193   : > { %v403_v45 = vpop.f32.mrb[0].mxu1 }
 0x194   : > { %v405_v46 = vpop.f32.mrb[1].mxu1 }
 0x195   : > { %v407_v47 = vpop.f32.mrb[2].mxu1 }
 0x196   : > { %v408_v48 = vpop.f32.mrb[3].mxu1 }
 0x19f   : > { %v703_v49 = vpop.f32.mrb[0].mxu0 }
 0x1a0   : > { %v856_v50 = vadd.f32 %v703_v49, %v403_v45  ;;  %v705_v51 = vpop.f32.mrb[1].mxu0 }
 0x1a1   : > { %v857_v52 = vadd.f32 %v705_v51, %v405_v46  ;;  %v707_v53 = vpop.f32.mrb[2].mxu0 }
 0x1a2   : > { %712 = vst [vmem:[%s160_s21] sm:$0xff] %v856_v50  ;;  %v708_v54 = vpop.f32.mrb[3].mxu0 }
 0x1a3   : > { %714 = vst.msk [vmem:[%s160_s21 + $0x8] sm:$0xff] %vm713_vm10, %v857_v52 }
 0x1a4   : > { %979 = shalt.err (!%p976_p7)
}
 0x1a5   : > { %s980_s4 = scalar_lea.hbm %s1234_s28, 256  ;;  %s984_s7 = scalar_lea.hbm %s1289_s2, 1024 }
 0x1a6   : > { %p981_p9 = scmp.ne.s32.totalorder %s1234_s28, %s980_s4  ;;  %p985_p12 = scmp.lt.u32.totalorder %s1234_s28, %s1289_s2 }
 0x1a7   : > { %p986_p13 = scmp.lt.u32.totalorder %s984_s7, %s980_s4  ;;  %p988_p1 = scmp.lt.u32.totalorder %s980_s4, %s1234_s28 }
 0x1a8   : > { %p982_p10 = pnand %p981_p9, %p1138_p3 }
 0x1a9   : > { %p987_p0 = por %p986_p13, %p985_p12 }
 0x1aa   : > { %p983_p11 = pneg %p982_p10 }
 0x1ab   : > { %p989_p2 = por %p988_p1, %p987_p0 }
 0x1ad   : > { %p990_p4 = pnand %p989_p2, %p983_p11 }
 0x1af   : > { %993 = shalt.err (!%p990_p4)
}
 0x1b0   : > { %886 = dma.vmem_to_hbm [thread:$0]  (%p1138_p3), %s1236_s24, 256, %s1234_s28, %s716_s12  }
 0x1b1 PF: > { %p892_p5 = scmp.ge.s32.totalorder %s1060_s16, 2  ;;  %s744_s18 = sand.u32 1, %s1032_s9  }
 0x1b2   : > { %s745_s21 = scalar_lea.sflag [#allocation3], %s744_s18 }
 0x1b3   : > { %p889_p6 = pnand %p892_p5, %p1147_p8 }
 0x1b5   : > { %1027 = dma.done.wait (!%p889_p6), %s745_s21, 256  }
 0x1b6   : > { %1029 = vsyncadd (!%p889_p6), %s745_s21, 4294967040  ;;  %s15_s16 = sadd.s32 1, %s1060_s16   ;;  %s1292_s9 = smov %s1036_s10 }
 0x1b7   : > { %p12_p7 = scmp.ge.s32.totalorder %s15_s16, 6   ;;  %s1293_s10 = smov %s1040_s11 }
 0x1b8   : > { %s1294_s11 = smov %s1156_s27  ;;  %s1295_s12 = smov %s1052_s14 }
 0x1b9   : > { %s1296_s13 = smov %s1056_s15  ;;  %s1297_s14 = smov %s1300_s19 }
 0x1ba   : > { %s1298_s15 = smov %s1304_s20  ;;  %14 = sbr.rel (!%p12_p7) target bundleno = 5 (0x5), region = 71 }
 0x1c1   :  { %750 = vsyncpa [#allocation3], 1 }
 0x1c2   :  { %752 = vsyncpa [#allocation3 + $0x1], 1 }

</bundles_post_ra>
